<compile_context>
chip_gen: v5e
topology: v5e:2x2
jax: 0.10.0
libtpu: 0.0.40
codegen_flags: <defaults>
</compile_context>

<pallas_src>
import functools

import jax
import jax.numpy as jnp
from jax import lax
from jax.experimental import pallas as pl
from jax.experimental.pallas import tpu as pltpu


def _rnn_fc_kernel(L, N, x_ref, h0_ref, wih_t_ref, whh_t_ref, b_ref,
                   wfc_ref, bfc_ref, y_ref, hout_ref):
    """Single-invocation kernel: full RNN recurrence + final Linear.

    x_ref     : (L*N, D)  f32   x pre-flattened in the wrapper
    h0_ref    : (N, H)    f32
    wih_t_ref : (D, H)    f32   (= W_ih^T)
    whh_t_ref : (H, H)    f32   (= W_hh^T)
    b_ref     : (1, H)    f32   (= b_ih + b_hh, folded once)
    wfc_ref   : (1, H)    f32   (= W_fc)
    bfc_ref   : (1,)      f32   SMEM scalar (= b_fc)
    y_ref     : (1, L)    f32   fc(output[:, -1]) emitted lane-major
    hout_ref  : (N, H)    f32   final hidden state
    """
    # One MXU matmul covers every timestep's input projection; bias folded once.
    xw = (jnp.dot(x_ref[...], wih_t_ref[...],
                  preferred_element_type=jnp.float32)
          + b_ref[...])                                   # (L*N, H)

    whh_t = whh_t_ref[...]                                # loop-invariant, loaded once

    h = h0_ref[...]                                       # (N, H)
    last_rows = []
    # Statically unrolled recurrence: only h -> tanh -> h is serial; the
    # last-row extracts feed the epilogue only and sit off the critical path.
    for t in range(L):
        pre = xw[t * N:(t + 1) * N, :] + jnp.dot(
            h, whh_t, preferred_element_type=jnp.float32)
        h = jnp.tanh(pre)                                 # (N, H)
        last_rows.append(h[N - 1:N, :])                   # last batch element, (1, H)
    hout_ref[...] = h

    # fc over all timesteps of the last batch element:
    #   (1, H) contracted with (L, H) on H  ->  (1, L)   (lane-major output)
    hlast = jnp.concatenate(last_rows, axis=0)            # (L, H)
    y = lax.dot_general(wfc_ref[...], hlast,
                        dimension_numbers=(((1,), (1,)), ((), ())),
                        preferred_element_type=jnp.float32)
    y_ref[...] = y + bfc_ref[0]


@jax.jit
def net_forward(x, hidden, wih, whh, bih, bhh, wfc, bfc):
    """JAX/Pallas equivalent of Net.forward(x, hidden).

    x      : (L, N, D)   hidden : (1, N, H)
    wih    : (H, D), whh: (H, H), bih: (H,), bhh: (H,)
    wfc    : (1, H), bfc: (1,)
    returns (y, h) with y: (L, 1), h: (1, N, H)
    """
    L, N, D = x.shape
    H = wih.shape[0]

    # Wrapper-side layout plumbing (free): flatten x, transpose weights,
    # fold the two RNN biases, squeeze the num_layers axis.
    x2 = x.reshape(L * N, D)                    # (L*N, D)
    h0 = hidden[0]                              # (N, H)
    wih_t = wih.T                               # (D, H)
    whh_t = whh.T                               # (H, H)
    b = (bih + bhh).reshape(1, H)               # folded bias
    wfc2 = wfc.reshape(1, H)
    bfc1 = bfc.reshape(1)

    vmem = pl.BlockSpec(memory_space=pltpu.MemorySpace.VMEM)
    smem = pl.BlockSpec(memory_space=pltpu.MemorySpace.SMEM)

    y_row, h_final = pl.pallas_call(
        functools.partial(_rnn_fc_kernel, L, N),
        out_shape=(
            jax.ShapeDtypeStruct((1, L), jnp.float32),
            jax.ShapeDtypeStruct((N, H), jnp.float32),
        ),
        in_specs=[vmem, vmem, vmem, vmem, vmem, vmem, smem],
        out_specs=(vmem, vmem),
        compiler_params=pltpu.CompilerParams(
            vmem_limit_bytes=8 * 1024 * 1024),
    )(x2, h0, wih_t, whh_t, b, wfc2, bfc1)

    y = y_row.reshape(L, 1)                     # back to PyTorch's (L, 1)
    return y, h_final[None]                     # h back to (1, N, H)


def _ref_forward(x, hidden, wih, whh, bih, bhh, wfc, bfc):
    """Pure-JAX reference matching torch.nn.RNN + Linear semantics."""
    L = x.shape[0]
    h = hidden[0]
    outs = []
    for t in range(L):
        h = jnp.tanh(x[t] @ wih.T + bih + h @ whh.T + bhh)
        outs.append(h)
    out = jnp.stack(outs)                # (L, N, H)
    y = out[:, -1] @ wfc.T + bfc         # (L, 1)  -- last BATCH element, all timesteps
    return y, h[None]


if __name__ == "__main__":
    # Small, deterministic shapes consistent with the module.
    L, N, D, H = 8, 2, 4, 32             # seq_len, batch, input_size, hidden_size

    key = jax.random.PRNGKey(0)
    ks = jax.random.split(key, 8)
    scale = 1.0 / jnp.sqrt(H)            # mimic PyTorch's U(-1/sqrt(H), 1/sqrt(H)) init

    x = jax.random.normal(ks[0], (L, N, D), dtype=jnp.float32)
    hidden = jax.random.normal(ks[1], (1, N, H), dtype=jnp.float32)

    wih = jax.random.uniform(ks[2], (H, D), jnp.float32, -scale, scale)
    whh = jax.random.uniform(ks[3], (H, H), jnp.float32, -scale, scale)
    bih = jax.random.uniform(ks[4], (H,), jnp.float32, -scale, scale)
    bhh = jax.random.uniform(ks[5], (H,), jnp.float32, -scale, scale)
    wfc = jax.random.uniform(ks[6], (1, H), jnp.float32, -scale, scale)
    bfc = jax.random.uniform(ks[7], (1,), jnp.float32, -scale, scale)

    y, h = net_forward(x, hidden, wih, whh, bih, bhh, wfc, bfc)
    jax.block_until_ready((y, h))

    y_ref, h_ref = _ref_forward(x, hidden, wih, whh, bih, bhh, wfc, bfc)
    assert y.shape == (L, 1) and h.shape == (1, N, H)
    assert jnp.allclose(y, y_ref, atol=1e-5, rtol=1e-5)
    assert jnp.allclose(h, h_ref, atol=1e-5, rtol=1e-5)

    print("KERNEL_OK")
</pallas_src>

<mosaic_0001>
module attributes {stable_mosaic.version = 11 : i64} {
  func.func @_rnn_fc_kernel(%arg0: memref<16x4xf32, #tpu.memory_space<vmem>>, %arg1: memref<2x32xf32, #tpu.memory_space<vmem>>, %arg2: memref<4x32xf32, #tpu.memory_space<vmem>>, %arg3: memref<32x32xf32, #tpu.memory_space<vmem>>, %arg4: memref<1x32xf32, #tpu.memory_space<vmem>>, %arg5: memref<1x32xf32, #tpu.memory_space<vmem>>, %arg6: memref<1xf32, #tpu.memory_space<smem>>, %arg7: memref<1x8xf32, #tpu.memory_space<vmem>>, %arg8: memref<2x32xf32, #tpu.memory_space<vmem>>) attributes {dimension_semantics = [], scalar_prefetch = 0 : i64, scratch_operands = 0 : i64, tpu.core_type = #tpu.core_type<tc>} {
    %c0 = arith.constant 0 : index
    %c0_0 = arith.constant 0 : index
    %0 = vector.load %arg0[%c0, %c0_0] : memref<16x4xf32, #tpu.memory_space<vmem>>, vector<16x4xf32>
    %c0_1 = arith.constant 0 : index
    %c0_2 = arith.constant 0 : index
    %1 = vector.load %arg2[%c0_1, %c0_2] : memref<4x32xf32, #tpu.memory_space<vmem>>, vector<4x32xf32>
    %cst = arith.constant dense<0.000000e+00> : vector<16x32xf32>
    %2 = tpu.matmul %0, %1, %cst {dimension_numbers = #tpu.dot_dimension_numbers<[1], [0], [0], [1], [0, 0, 1, 1], [], []>} : vector<16x4xf32>, vector<4x32xf32>, vector<16x32xf32> -> vector<16x32xf32>
    %c0_3 = arith.constant 0 : index
    %c0_4 = arith.constant 0 : index
    %3 = vector.load %arg4[%c0_3, %c0_4] : memref<1x32xf32, #tpu.memory_space<vmem>>, vector<1x32xf32>
    %4 = vector.broadcast %3 : vector<1x32xf32> to vector<16x32xf32>
    %5 = arith.addf %2, %4 : vector<16x32xf32>
    %c0_5 = arith.constant 0 : index
    %c0_6 = arith.constant 0 : index
    %6 = vector.load %arg3[%c0_5, %c0_6] : memref<32x32xf32, #tpu.memory_space<vmem>>, vector<32x32xf32>
    %c0_7 = arith.constant 0 : index
    %c0_8 = arith.constant 0 : index
    %7 = vector.load %arg1[%c0_7, %c0_8] : memref<2x32xf32, #tpu.memory_space<vmem>>, vector<2x32xf32>
    %8 = vector.extract_strided_slice %5 {offsets = [0, 0], sizes = [2, 32], strides = [1, 1]} : vector<16x32xf32> to vector<2x32xf32>
    %cst_9 = arith.constant dense<0.000000e+00> : vector<2x32xf32>
    %9 = tpu.matmul %7, %6, %cst_9 {dimension_numbers = #tpu.dot_dimension_numbers<[1], [0], [0], [1], [0, 0, 1, 1], [], []>} : vector<2x32xf32>, vector<32x32xf32>, vector<2x32xf32> -> vector<2x32xf32>
    %10 = arith.addf %8, %9 : vector<2x32xf32>
    %11 = math.tanh %10 : vector<2x32xf32>
    %12 = vector.extract_strided_slice %11 {offsets = [1, 0], sizes = [1, 32], strides = [1, 1]} : vector<2x32xf32> to vector<1x32xf32>
    %13 = vector.extract_strided_slice %5 {offsets = [2, 0], sizes = [2, 32], strides = [1, 1]} : vector<16x32xf32> to vector<2x32xf32>
    %cst_10 = arith.constant dense<0.000000e+00> : vector<2x32xf32>
    %14 = tpu.matmul %11, %6, %cst_10 {dimension_numbers = #tpu.dot_dimension_numbers<[1], [0], [0], [1], [0, 0, 1, 1], [], []>} : vector<2x32xf32>, vector<32x32xf32>, vector<2x32xf32> -> vector<2x32xf32>
    %15 = arith.addf %13, %14 : vector<2x32xf32>
    %16 = math.tanh %15 : vector<2x32xf32>
    %17 = vector.extract_strided_slice %16 {offsets = [1, 0], sizes = [1, 32], strides = [1, 1]} : vector<2x32xf32> to vector<1x32xf32>
    %18 = vector.extract_strided_slice %5 {offsets = [4, 0], sizes = [2, 32], strides = [1, 1]} : vector<16x32xf32> to vector<2x32xf32>
    %cst_11 = arith.constant dense<0.000000e+00> : vector<2x32xf32>
    %19 = tpu.matmul %16, %6, %cst_11 {dimension_numbers = #tpu.dot_dimension_numbers<[1], [0], [0], [1], [0, 0, 1, 1], [], []>} : vector<2x32xf32>, vector<32x32xf32>, vector<2x32xf32> -> vector<2x32xf32>
    %20 = arith.addf %18, %19 : vector<2x32xf32>
    %21 = math.tanh %20 : vector<2x32xf32>
    %22 = vector.extract_strided_slice %21 {offsets = [1, 0], sizes = [1, 32], strides = [1, 1]} : vector<2x32xf32> to vector<1x32xf32>
    %23 = vector.extract_strided_slice %5 {offsets = [6, 0], sizes = [2, 32], strides = [1, 1]} : vector<16x32xf32> to vector<2x32xf32>
    %cst_12 = arith.constant dense<0.000000e+00> : vector<2x32xf32>
    %24 = tpu.matmul %21, %6, %cst_12 {dimension_numbers = #tpu.dot_dimension_numbers<[1], [0], [0], [1], [0, 0, 1, 1], [], []>} : vector<2x32xf32>, vector<32x32xf32>, vector<2x32xf32> -> vector<2x32xf32>
    %25 = arith.addf %23, %24 : vector<2x32xf32>
    %26 = math.tanh %25 : vector<2x32xf32>
    %27 = vector.extract_strided_slice %26 {offsets = [1, 0], sizes = [1, 32], strides = [1, 1]} : vector<2x32xf32> to vector<1x32xf32>
    %28 = vector.extract_strided_slice %5 {offsets = [8, 0], sizes = [2, 32], strides = [1, 1]} : vector<16x32xf32> to vector<2x32xf32>
    %cst_13 = arith.constant dense<0.000000e+00> : vector<2x32xf32>
    %29 = tpu.matmul %26, %6, %cst_13 {dimension_numbers = #tpu.dot_dimension_numbers<[1], [0], [0], [1], [0, 0, 1, 1], [], []>} : vector<2x32xf32>, vector<32x32xf32>, vector<2x32xf32> -> vector<2x32xf32>
    %30 = arith.addf %28, %29 : vector<2x32xf32>
    %31 = math.tanh %30 : vector<2x32xf32>
    %32 = vector.extract_strided_slice %31 {offsets = [1, 0], sizes = [1, 32], strides = [1, 1]} : vector<2x32xf32> to vector<1x32xf32>
    %33 = vector.extract_strided_slice %5 {offsets = [10, 0], sizes = [2, 32], strides = [1, 1]} : vector<16x32xf32> to vector<2x32xf32>
    %cst_14 = arith.constant dense<0.000000e+00> : vector<2x32xf32>
    %34 = tpu.matmul %31, %6, %cst_14 {dimension_numbers = #tpu.dot_dimension_numbers<[1], [0], [0], [1], [0, 0, 1, 1], [], []>} : vector<2x32xf32>, vector<32x32xf32>, vector<2x32xf32> -> vector<2x32xf32>
    %35 = arith.addf %33, %34 : vector<2x32xf32>
    %36 = math.tanh %35 : vector<2x32xf32>
    %37 = vector.extract_strided_slice %36 {offsets = [1, 0], sizes = [1, 32], strides = [1, 1]} : vector<2x32xf32> to vector<1x32xf32>
    %38 = vector.extract_strided_slice %5 {offsets = [12, 0], sizes = [2, 32], strides = [1, 1]} : vector<16x32xf32> to vector<2x32xf32>
    %cst_15 = arith.constant dense<0.000000e+00> : vector<2x32xf32>
    %39 = tpu.matmul %36, %6, %cst_15 {dimension_numbers = #tpu.dot_dimension_numbers<[1], [0], [0], [1], [0, 0, 1, 1], [], []>} : vector<2x32xf32>, vector<32x32xf32>, vector<2x32xf32> -> vector<2x32xf32>
    %40 = arith.addf %38, %39 : vector<2x32xf32>
    %41 = math.tanh %40 : vector<2x32xf32>
    %42 = vector.extract_strided_slice %41 {offsets = [1, 0], sizes = [1, 32], strides = [1, 1]} : vector<2x32xf32> to vector<1x32xf32>
    %43 = vector.extract_strided_slice %5 {offsets = [14, 0], sizes = [2, 32], strides = [1, 1]} : vector<16x32xf32> to vector<2x32xf32>
    %cst_16 = arith.constant dense<0.000000e+00> : vector<2x32xf32>
    %44 = tpu.matmul %41, %6, %cst_16 {dimension_numbers = #tpu.dot_dimension_numbers<[1], [0], [0], [1], [0, 0, 1, 1], [], []>} : vector<2x32xf32>, vector<32x32xf32>, vector<2x32xf32> -> vector<2x32xf32>
    %45 = arith.addf %43, %44 : vector<2x32xf32>
    %46 = math.tanh %45 : vector<2x32xf32>
    %47 = vector.extract_strided_slice %46 {offsets = [1, 0], sizes = [1, 32], strides = [1, 1]} : vector<2x32xf32> to vector<1x32xf32>
    %c0_17 = arith.constant 0 : index
    %c0_18 = arith.constant 0 : index
    %48 = vector.load %arg8[%c0_17, %c0_18] : memref<2x32xf32, #tpu.memory_space<vmem>>, vector<2x32xf32>
    tpu.vector_store %arg8[%c0_17, %c0_18], %46 {strides = array<i32>} : memref<2x32xf32, #tpu.memory_space<vmem>>, vector<2x32xf32>,
    %49 = tpu.concatenate %12, %17, %22, %27, %32, %37, %42, %47 in 0 : vector<1x32xf32>, vector<1x32xf32>, vector<1x32xf32>, vector<1x32xf32>, vector<1x32xf32>, vector<1x32xf32>, vector<1x32xf32>, vector<1x32xf32> -> vector<8x32xf32>
    %c0_19 = arith.constant 0 : index
    %c0_20 = arith.constant 0 : index
    %50 = vector.load %arg5[%c0_19, %c0_20] : memref<1x32xf32, #tpu.memory_space<vmem>>, vector<1x32xf32>
    %cst_21 = arith.constant dense<0.000000e+00> : vector<1x8xf32>
    %51 = tpu.matmul %50, %49, %cst_21 {dimension_numbers = #tpu.dot_dimension_numbers<[1], [1], [0], [0], [0, 0, 1, 0], [], []>} : vector<1x32xf32>, vector<8x32xf32>, vector<1x8xf32> -> vector<1x8xf32>
    %c0_22 = arith.constant 0 : index
    %52 = memref.load %arg6[%c0_22] : memref<1xf32, #tpu.memory_space<smem>>
    %53 = vector.broadcast %52 : f32 to vector<1x8xf32>
    %54 = arith.addf %51, %53 : vector<1x8xf32>
    %c0_23 = arith.constant 0 : index
    %c0_24 = arith.constant 0 : index
    %55 = vector.load %arg7[%c0_23, %c0_24] : memref<1x8xf32, #tpu.memory_space<vmem>>, vector<1x8xf32>
    tpu.vector_store %arg7[%c0_23, %c0_24], %54 {strides = array<i32>} : memref<1x8xf32, #tpu.memory_space<vmem>>, vector<1x8xf32>,
    return
  }
}

</mosaic_0001>

<bundles_post_ra>
// kernel: net_forward.1
= control target key start
LH: loop header
LB: loop body
LE: loop exit
PB: predicated region body
PF: predicated region fallthrough
CT: control target
= control target key end

     0   :  { %15 = vsyncpa [#allocation4], 0  ;;  %vm45_vm0 = vcmask 1043456   ;;  %vm38_vm1 = vcmask 31744   ;;  %s576_s0 = inlined_call_operand.vmem [shape: f32[16,4], index: 0, kind: input, shape index: {}]   ;;  %s577_s1 = inlined_call_operand.vmem [shape: f32[2,32], index: 1, kind: input, shape index: {}]   ;;  %s578_s2 = inlined_call_operand.vmem [shape: f32[4,32], index: 2, kind: input, shape index: {}]   ;;  %s579_s3 = inlined_call_operand.vmem [shape: f32[32,32], index: 3, kind: input, shape index: {}]   ;;  %s580_s4 = inlined_call_operand.vmem [shape: f32[1,32], index: 4, kind: input, shape index: {}]   ;;  %s581_s5 = inlined_call_operand.vmem [shape: f32[1,32], index: 5, kind: input, shape index: {}]   ;;  %s582_s6 = inlined_call_operand.<no memory space> [shape: f32[1], index: 6, kind: input, shape index: {}]   ;;  %s583_s7 = inlined_call_operand.hbm [shape: f32[1,8], index: 7, kind: output, shape index: {0}]   ;;  %s584_s8 = inlined_call_operand.hbm [shape: f32[2,32], index: 8, kind: output, shape index: {1}]  }
   0x1   :  { %v75_v0 = vld [vmem:[%s579_s3 + $0x18] sm:$0xff]  ;;  %v74_v1 = vld [vmem:[%s579_s3 + $0x10] sm:$0xff]  ;;  %v33_v2 = vld [vmem:[%s578_s2] sm:$0xf] }
   0x2   :  { %93 = vmatpush.msra.mxu1 %v75_v0  ;;  %392 = vmatpush.msk.msra.mxu0 %vm45_vm0, %v33_v2  ;;  %v31_v3 = vld [vmem:[%s576_s0] sm:$0xff]  ;;  %v73_v4 = vld [vmem:[%s579_s3 + $0x8] sm:$0xff] }
   0x3   :  { %393 = vmatmul.msk.f32.vlgmr.msra.gmra.mxu0 %vm38_vm1, %v31_v3  ;;  %118 = vmatpush.msra.mxu2 %v75_v0 }
   0x4   :  { %94 = vmatpush.msra.mxu1 %v74_v1  ;;  %147 = vmatpush.msra.mxu3 %v75_v0 }
   0x5   :  { %16 = vsyncpa [#allocation6], 0  ;;  %v72_v5 = vld [vmem:[%s579_s3] sm:$0xff]  ;;  %119 = vmatpush.msra.mxu2 %v74_v1  ;;  %259 = vmatpush.msrb.mxu0 %v75_v0  ;;  %vm77_vm2 = vcmask 261120   ;;  %vm316_vm3 = vcmask 1040384   ;;  %vm318_vm4 = vcmask 1041408   ;;  %v331_v62 = vstv %s582_s6 }
   0x6   :  { %95 = vmatpush.msra.mxu1 %v73_v4  ;;  %v76_v6 = vld [vmem:[%s577_s1] sm:$0x3]  ;;  %148 = vmatpush.msra.mxu3 %v74_v1  ;;  %v32_v27 = vld [vmem:[%s576_s0 + $0x8] sm:$0xff]  ;;  %vm320_vm5 = vcmask 1042432   ;;  %vm323_vm6 = vcmask 1044480   ;;  %vm325_vm7 = vcmask 1045504  }
   0x7   :  { %120 = vmatpush.msra.mxu2 %v73_v4  ;;  %260 = vmatpush.msrb.mxu0 %v74_v1  ;;  %v407_v7 = vld [vmem:[%s580_s4] ss:$0 sm:$0xff]  ;;  %vm327_vm8 = vcmask 1046528   ;;  %vm301_vm9 = vcmask 261126   ;;  %s476_s20 = smov [#allocation5]   ;;  %s378_s24 = sshll.u32 %s584_s8, 4  ;;  %s379_s24 = int_to_ptr.hbm [resolvable:$true] %s378_s24 }
   0x8   :  { %96 = vmatpush.msra.mxu1 %v72_v5  ;;  %149 = vmatpush.msra.mxu3 %v73_v4  ;;  %v329_v61 = vld [vmem:[%s581_s5] sm:$0x1]  ;;  %s376_s21 = sshll.u32 %s476_s20, 4  ;;  %s477_s27 = smov [#allocation3]   ;;  %vm358_vm10 = vcmask 57344   ;;  %s377_s21 = int_to_ptr.vmem [resolvable:$true] %s376_s21 }
   0x9   :  { %395 = vmatmul.msk.f32.vlgmr.msra.gmra.mxu1 %vm77_vm2, %v76_v6  ;;  %121 = vmatpush.msra.mxu2 %v72_v5  ;;  %s365_s28 = sshll.u32 %s477_s27, 4  ;;  %s367_s5 = sshll.u32 %s583_s7, 4  ;;  %s366_s28 = int_to_ptr.vmem [resolvable:$true] %s365_s28  ;;  %s368_s5 = int_to_ptr.hbm [resolvable:$true] %s367_s5 }
   0xa   :  { %150 = vmatpush.msra.mxu3 %v72_v5  ;;  %176 = vmatpush.msrb.mxu1 %v75_v0 }
   0xb   :  { %205 = vmatpush.msrb.mxu2 %v75_v0  ;;  %261 = vmatpush.msrb.mxu0 %v73_v4 }
   0xc   :  { %230 = vmatpush.msrb.mxu3 %v75_v0  ;;  %177 = vmatpush.msrb.mxu1 %v74_v1 }
   0xd   :  { %206 = vmatpush.msrb.mxu2 %v74_v1  ;;  %262 = vmatpush.msrb.mxu0 %v72_v5 }
   0xe   :  { %231 = vmatpush.msrb.mxu3 %v74_v1  ;;  %178 = vmatpush.msrb.mxu1 %v73_v4 }
   0xf   :  { %207 = vmatpush.msrb.mxu2 %v73_v4  ;;  %394 = vmatmul.msk.f32.gmra.mxu0 %vm38_vm1, %v32_v27 }
  0x10   :  { %232 = vmatpush.msrb.mxu3 %v73_v4  ;;  %179 = vmatpush.msrb.mxu1 %v72_v5 }
  0x11   :  { %208 = vmatpush.msrb.mxu2 %v72_v5 }
  0x12   :  { %233 = vmatpush.msrb.mxu3 %v72_v5  ;;  %288 = vmatpush.msra.mxu1 %v75_v0 }
  0x14   :  { %289 = vmatpush.msra.mxu1 %v74_v1 }
  0x16   :  { %290 = vmatpush.msra.mxu1 %v73_v4 }
  0x18   :  { %291 = vmatpush.msra.mxu1 %v72_v5 }
  0x80   :  { %v66_v8 = vpop.f32.mrf.mxu0 }
  0x81   :  { %v67_v9 = vadd.f32 %v407_v7, %v66_v8 }
  0x86   :  { %v98_v10 = vpop.f32.mrf.mxu1 }
  0x87   :  { %v101_v11 = vadd.f32 %v98_v10, %v67_v9 }
  0x89   :  { %408 = vtanh.f32 %v101_v11 }
  0x8c   :  { %v69_v35 = vpop.f32.mrf.mxu0 }
  0x8d   :  { %v70_v36 = vadd.f32 %v407_v7, %v69_v35 }
  0x8f   :  { %v409_v12 = vpop.eup %408 }
  0x90   :  { %396 = vmatmul.msk.f32.vlgmr.msra.gmra.mxu2 %vm77_vm2, %v409_v12  ;;  %v303_v17 = vrot.slane %v409_v12, 1 }
 0x113   :  { %v123_v13 = vpop.f32.mrf.mxu2 }
 0x114   :  { %v127_v14 = vrot.slane %v123_v13, 6 }
 0x116   :  { %v129_v15 = vadd.f32 %v127_v14, %v67_v9 }
 0x118   :  { %410 = vtanh.f32 %v129_v15 }
 0x11e   :  { %v411_v16 = vpop.eup %410 }
 0x11f   :  { %v132_v18 = vrot.slane %v411_v16, 2 }
 0x121   :  { %397 = vmatmul.msk.f32.vlgmr.msra.gmra.mxu3 %vm77_vm2, %v132_v18  ;;  %v317_v19 = vsel %vm316_vm3, %v303_v17, %v132_v18 }
 0x1a4   :  { %v152_v20 = vpop.f32.mrf.mxu3 }
 0x1a5   :  { %v156_v21 = vrot.slane %v152_v20, 4 }
 0x1a7   :  { %v158_v22 = vadd.f32 %v156_v21, %v67_v9 }
 0x1a9   :  { %412 = vtanh.f32 %v158_v22 }
 0x1af   :  { %v413_v23 = vpop.eup %412 }
 0x1b0   :  { %v306_v24 = vrot.slane %v413_v23, 3  ;;  %v161_v25 = vrot.slane %v413_v23, 4 }
 0x1b2   :  { %v319_v26 = vsel %vm318_vm4, %v317_v19, %v306_v24  ;;  %398 = vmatmul.msk.f32.vlgmr.msrb.gmra.mxu1 %vm77_vm2, %v161_v25 }
 0x22f   :  { %v181_v28 = vpop.f32.mrf.mxu1 }
 0x230   :  { %v185_v29 = vrot.slane %v181_v28, 2 }
 0x232   :  { %v187_v30 = vadd.f32 %v185_v29, %v67_v9 }
 0x234   :  { %414 = vtanh.f32 %v187_v30 }
 0x23a   :  { %v415_v31 = vpop.eup %414 }
 0x23b   :  { %v308_v32 = vrot.slane %v415_v31, 4  ;;  %v190_v33 = vrot.slane %v415_v31, 6 }
 0x23d   :  { %v321_v34 = vsel %vm320_vm5, %v319_v26, %v308_v32  ;;  %399 = vmatmul.msk.f32.vlgmr.msrb.gmra.mxu2 %vm77_vm2, %v190_v33 }
 0x2c0   :  { %v210_v37 = vpop.f32.mrf.mxu2 }
 0x2c1   :  { %v213_v38 = vadd.f32 %v210_v37, %v70_v36 }
 0x2c3   :  { %416 = vtanh.f32 %v213_v38 }
 0x2c9   :  { %v417_v39 = vpop.eup %416 }
 0x2ca   :  { %v310_v40 = vrot.slane %v417_v39, 5  ;;  %400 = vmatmul.msk.f32.vlgmr.msrb.gmra.mxu3 %vm77_vm2, %v417_v39 }
 0x2cc   :  { %v322_v41 = vsel %vm45_vm0, %v321_v34, %v310_v40 }
 0x34d   :  { %v235_v42 = vpop.f32.mrf.mxu3 }
 0x34e   :  { %v239_v43 = vrot.slane %v235_v42, 6 }
 0x350   :  { %v241_v44 = vadd.f32 %v239_v43, %v70_v36 }
 0x352   :  { %418 = vtanh.f32 %v241_v44 }
 0x358   :  { %v419_v45 = vpop.eup %418 }
 0x359   :  { %v312_v46 = vrot.slane %v419_v45, 6  ;;  %v244_v47 = vrot.slane %v419_v45, 2 }
 0x35b   :  { %401 = vmatmul.msk.f32.vlgmr.msrb.gmra.mxu0 %vm77_vm2, %v244_v47  ;;  %v324_v48 = vsel %vm323_vm6, %v322_v41, %v312_v46 }
 0x3d8   :  { %v264_v49 = vpop.f32.mrf.mxu0 }
 0x3d9   :  { %v268_v50 = vrot.slane %v264_v49, 4 }
 0x3db   :  { %v270_v51 = vadd.f32 %v268_v50, %v70_v36 }
 0x3dd   :  { %420 = vtanh.f32 %v270_v51 }
 0x3e3   :  { %v421_v52 = vpop.eup %420 }
 0x3e4   :  { %v273_v53 = vrot.slane %v421_v52, 4  ;;  %v314_v54 = vrot.slane %v421_v52, 7 }
 0x3e6   :  { %402 = vmatmul.msk.f32.vlgmr.msra.gmra.mxu1 %vm77_vm2, %v273_v53  ;;  %v326_v55 = vsel %vm325_vm7, %v324_v48, %v314_v54 }
 0x463   :  { %v293_v56 = vpop.f32.mrf.mxu1 }
 0x464   :  { %v297_v57 = vrot.slane %v293_v56, 2 }
 0x466   :  { %v299_v58 = vadd.f32 %v297_v57, %v70_v36 }
 0x468   :  { %422 = vtanh.f32 %v299_v58 }
 0x46e   :  { %v423_v59 = vpop.eup %422 }
 0x46f   :  { %v328_v60 = vsel %vm327_vm8, %v326_v55, %v423_v59  ;;  %302 = vst.msk [vmem:[#allocation5 - $0x6] sm:$0xc0] %vm301_vm9, %v423_v59 }
 0x470   :  { %403 = vmatpush.xpose.msk.msra.mxu2 %vm77_vm2, %v328_v60  ;;  %381 = dma.vmem_to_hbm [thread:$0]  %s377_s21, 32, %s379_s24, [#allocation6]  }
 0x473   :  { %404 = vmatmul.msk.f32.vlgmr.msra.gmra.mxu2 %vm77_vm2, %v329_v61 }
 0x4f6   :  { %v355_v63 = vpop.f32.mrf.mxu2 }
 0x4f7   :  { %v356_v0 = vadd.f32 %v355_v63, %v331_v62 }
 0x4f9   :  { %359 = vst.msk [vmem:[#allocation3] sm:$0x1] %vm358_vm10, %v356_v0 }
 0x4fa   :  { %370 = dma.vmem_to_hbm [thread:$0]  %s366_s28, 16, %s368_s5, [#allocation4]  }
 0x4fb   :  { %472 = dma.done.wait [#allocation4], 16  }
 0x4fc   :  { %473 = vsyncadd [#allocation4], 4294967280 }
 0x4fd   :  { %474 = dma.done.wait [#allocation6], 32  }
 0x4fe   :  { %475 = vsyncadd [#allocation6], 4294967264 }
 0x4ff   :  { %390 = vsyncpa [#allocation4], 1 }
 0x500   :  { %391 = vsyncpa [#allocation6], 1 }

</bundles_post_ra>
